<compile_context>
chip_gen: v7x
topology: tpu7x:2x2x1
jax: 0.10.0
libtpu: 0.0.40
codegen_flags: <defaults>
</compile_context>

<pallas_src>
import jax
import jax.numpy as jnp
from jax import lax
from jax.experimental import pallas as pl
from jax.experimental.pallas import tpu as pltpu


def _choose_tile_rows(B, K, N, itemsize, budget_bytes):
    """Largest row-tile that fits the VMEM budget (double-buffered x & y + resident R)."""
    bytes_per_row = 2 * 2 * K * itemsize          # x tile + y tile, double-buffered
    resident = 2 * K * N * itemsize               # R (conservatively double-counted)
    avail = max(budget_bytes - resident, 8 * bytes_per_row)
    cap = avail // bytes_per_row
    cap = min(cap, 2048)                          # diminishing returns beyond this
    if cap >= 256:
        cap = (cap // 256) * 256                  # MXU-friendly row count
    else:
        cap = max(8, (cap // 8) * 8)
    if B <= cap:
        return B                                  # single block: block dim == array dim is legal
    return cap


def l2_norm_pallas(x, y, R, *, tile_rows=None, use_bf16_matmul=False,
                   vmem_budget_bytes=24 * 1024 * 1024):
    """Frobenius norm of (x - y) @ R, computed with a tiled Pallas TPU kernel."""
    x = jnp.asarray(x)
    y = jnp.asarray(y)
    R = jnp.asarray(R)
    if x.ndim == 1:                               # module also accepts plain vectors
        x = x[None, :]
        y = y[None, :]
    B, K = x.shape
    K2, N = R.shape
    assert K == K2 and y.shape == x.shape

    if tile_rows is None:
        tile_rows = _choose_tile_rows(B, K, N, x.dtype.itemsize, vmem_budget_bytes)
    num_tiles = pl.cdiv(B, tile_rows)
    need_mask = (B % tile_rows) != 0

    def kernel(x_ref, y_ref, r_ref, out_ref):
        diff = x_ref[...] - y_ref[...]
        if need_mask:
            # Ragged last tile: zero out rows past B (exact -- they add 0 to the sum).
            row = (pl.program_id(0) * tile_rows
                   + lax.broadcasted_iota(jnp.int32, diff.shape, 0))
            diff = jnp.where(row < B, diff, jnp.zeros_like(diff))
        rhs = r_ref[...]
        if use_bf16_matmul:                       # optional relaxed-precision MXU path
            diff = diff.astype(jnp.bfloat16)
            rhs = rhs.astype(jnp.bfloat16)
        t = jnp.dot(diff, rhs, preferred_element_type=jnp.float32)
        partial = jnp.sum(t * t)                  # one reduce per (large) tile
        out_ref[...] = jnp.broadcast_to(partial, out_ref.shape)

    partials = pl.pallas_call(
        kernel,
        out_shape=jax.ShapeDtypeStruct((num_tiles, 8, 128), jnp.float32),
        grid_spec=pltpu.PrefetchScalarGridSpec(
            num_scalar_prefetch=0,
            grid=(num_tiles,),
            in_specs=[
                pl.BlockSpec((tile_rows, K), lambda i: (i, 0)),   # x tile (streamed)
                pl.BlockSpec((tile_rows, K), lambda i: (i, 0)),   # y tile (streamed)
                pl.BlockSpec((K, N), lambda i: (0, 0)),           # R (VMEM resident)
            ],
            out_specs=pl.BlockSpec((1, 8, 128), lambda i: (i, 0, 0)),  # per-tile partial
        ),
        compiler_params=pltpu.CompilerParams(
            dimension_semantics=("parallel",),        # independent tiles -> megacore OK
            vmem_limit_bytes=48 * 1024 * 1024,        # allow big tiles on v5e's 16 MiB default
        ),
    )(x, y, R)

    # Tiny final reduction (num_tiles scalars) + sqrt in the wrapper.
    return jnp.sqrt(jnp.sum(partials[:, 0, 0]))


if __name__ == "__main__":
    key = jax.random.PRNGKey(0)
    kx, ky, kr = jax.random.split(key, 3)

    # Small shapes consistent with the module's forward: (B, K) snapshots, (K, N) basis.
    B, K, N = 203, 32, 24
    x = jax.random.normal(kx, (B, K), dtype=jnp.float32)
    y = jax.random.normal(ky, (B, K), dtype=jnp.float32)
    R = jax.random.normal(kr, (K, N), dtype=jnp.float32)

    ref = jnp.linalg.norm((x - y) @ R)

    # Auto-tiled path (single large tile for this small B).
    out = jax.block_until_ready(l2_norm_pallas(x, y, R))
    assert jnp.allclose(out, ref, rtol=1e-4, atol=1e-4), (out, ref)

    # Multi-tile path with a ragged last tile (exercises masking + parallel grid).
    out2 = jax.block_until_ready(l2_norm_pallas(x, y, R, tile_rows=64))
    assert jnp.allclose(out2, ref, rtol=1e-4, atol=1e-4), (out2, ref)

    print("KERNEL_OK")
</pallas_src>

<mosaic_0001>
module attributes {stable_mosaic.version = 11 : i64} {
  func.func @kernel(%arg0: i32, %arg1: memref<203x32xf32, #tpu.memory_space<vmem>>, %arg2: memref<203x32xf32, #tpu.memory_space<vmem>>, %arg3: memref<32x24xf32, #tpu.memory_space<vmem>>, %arg4: memref<1x8x128xf32, #tpu.memory_space<vmem>>) attributes {dimension_semantics = [#tpu.dimension_semantics<parallel>], iteration_bounds = array<i64: 1>, scalar_prefetch = 0 : i64, scratch_operands = 0 : i64, tpu.core_type = #tpu.core_type<tc>, window_params = [{transform_indices = @transform_0, window_bounds = array<i64: 203, 32>}, {transform_indices = @transform_1, window_bounds = array<i64: 203, 32>}, {pipeline_mode = #tpu.pipeline_mode<synchronous>, transform_indices = @transform_2, window_bounds = array<i64: 32, 24>}, {transform_indices = @transform_3, window_bounds = array<i64: 1, 8, 128>}]} {
    %c0 = arith.constant 0 : index
    %c0_0 = arith.constant 0 : index
    %0 = vector.load %arg1[%c0, %c0_0] : memref<203x32xf32, #tpu.memory_space<vmem>>, vector<203x32xf32>
    %c0_1 = arith.constant 0 : index
    %c0_2 = arith.constant 0 : index
    %1 = vector.load %arg2[%c0_1, %c0_2] : memref<203x32xf32, #tpu.memory_space<vmem>>, vector<203x32xf32>
    %2 = arith.subf %0, %1 : vector<203x32xf32>
    %c0_3 = arith.constant 0 : index
    %c0_4 = arith.constant 0 : index
    %3 = vector.load %arg3[%c0_3, %c0_4] : memref<32x24xf32, #tpu.memory_space<vmem>>, vector<32x24xf32>
    %cst = arith.constant dense<0.000000e+00> : vector<203x24xf32>
    %4 = tpu.matmul %2, %3, %cst {dimension_numbers = #tpu.dot_dimension_numbers<[1], [0], [0], [1], [0, 0, 1, 1], [], []>} : vector<203x32xf32>, vector<32x24xf32>, vector<203x24xf32> -> vector<203x24xf32>
    %5 = arith.mulf %4, %4 : vector<203x24xf32>
    %6 = vector.shape_cast %5 : vector<203x24xf32> to vector<1x203x24xf32>
    %cst_5 = arith.constant dense<0.000000e+00> : vector<1xf32>
    %7 = vector.multi_reduction <add>, %6, %cst_5 [1, 2] : vector<1x203x24xf32> to vector<1xf32>
    %8 = vector.shape_cast %7 : vector<1xf32> to vector<1x1x1xf32>
    %9 = vector.extract %8[0, 0, 0] : f32 from vector<1x1x1xf32>
    %10 = vector.broadcast %9 : f32 to vector<1x8x128xf32>
    %c0_6 = arith.constant 0 : index
    %c0_7 = arith.constant 0 : index
    %c0_8 = arith.constant 0 : index
    %11 = vector.load %arg4[%c0_6, %c0_7, %c0_8] : memref<1x8x128xf32, #tpu.memory_space<vmem>>, vector<1x8x128xf32>
    tpu.vector_store %arg4[%c0_6, %c0_7, %c0_8], %10 {strides = array<i32>} : memref<1x8x128xf32, #tpu.memory_space<vmem>>, vector<1x8x128xf32>,
    return
  }
  func.func @transform_0(%arg0: i32) -> (i32, i32) {
    %c0_i32 = arith.constant 0 : i32
    %c0_i32_0 = arith.constant 0 : i32
    return %arg0, %c0_i32 : i32, i32
  }
  func.func @transform_1(%arg0: i32) -> (i32, i32) {
    %c0_i32 = arith.constant 0 : i32
    %c0_i32_0 = arith.constant 0 : i32
    return %arg0, %c0_i32 : i32, i32
  }
  func.func @transform_2(%arg0: i32) -> (i32, i32) {
    %c0_i32 = arith.constant 0 : i32
    %c0_i32_0 = arith.constant 0 : i32
    %c0_i32_1 = arith.constant 0 : i32
    return %c0_i32, %c0_i32_0 : i32, i32
  }
  func.func @transform_3(%arg0: i32) -> (i32, i32, i32) {
    %c0_i32 = arith.constant 0 : i32
    %c0_i32_0 = arith.constant 0 : i32
    %c0_i32_1 = arith.constant 0 : i32
    return %arg0, %c0_i32, %c0_i32_0 : i32, i32, i32
  }
}

</mosaic_0001>

<bundles_post_ra>
// kernel: tpu_custom_call.1
= control target key start
LH: loop header
LB: loop body
LE: loop exit
PB: predicated region body
PF: predicated region fallthrough
CT: control target
= control target key end

     0   :  { %vm97_vm0 = vcmask 261120   ;;  %s869_s0 = inlined_call_operand.vmem [shape: f32[203,32], index: 0, kind: input, shape index: {}]   ;;  %s870_s1 = inlined_call_operand.vmem [shape: f32[203,32], index: 1, kind: input, shape index: {}]   ;;  %s871_s2 = inlined_call_operand.vmem [shape: f32[32,24], index: 2, kind: input, shape index: {}]   ;;  %s872_s3 = inlined_call_operand.hbm [shape: f32[1,8,128], index: 3, kind: output, shape index: {}]  }
   0x1   :  { %v93_v0 = vld [vmem:[%s871_s2] sm:$0xff]  ;;  %v94_v1 = vld [vmem:[%s871_s2 + $0x8] sm:$0xff]  ;;  %v95_v2 = vld [vmem:[%s871_s2 + $0x10] sm:$0xff] }
   0x2   :  { %v578_v3 = vpack.c.bf16 %v94_v1, %v93_v0  ;;  %v96_v4 = vld [vmem:[%s871_s2 + $0x18] sm:$0xff]  ;;  %v15_v5 = vld [vmem:[%s869_s0] sm:$0xff]  ;;  %v16_v9 = vld [vmem:[%s869_s0 + $0x8] sm:$0xff] }
   0x3   :  { %v41_v6 = vld [vmem:[%s870_s1] sm:$0xff]  ;;  %v582_v7 = vpack.c.bf16 %v96_v4, %v95_v2  ;;  %v42_v10 = vld [vmem:[%s870_s1 + $0x8] sm:$0xff]  ;;  %v17_v11 = vld [vmem:[%s869_s0 + $0x10] sm:$0xff] }
   0x4   :  { %v67_v8 = vsub.f32 %v15_v5, %v41_v6  ;;  %579 = vmatprep.subr.bf16.mxu0 %v578_v3  ;;  %586 = vmatprep.subr.bf16.mxu1 %v578_v3  ;;  %v43_v12 = vld [vmem:[%s870_s1 + $0x10] sm:$0xff]  ;;  %v68_v13 = vsub.f32 %v16_v9, %v42_v10  ;;  %v18_v15 = vld [vmem:[%s869_s0 + $0x18] sm:$0xff]  ;;  %v19_v17 = vld [vmem:[%s869_s0 + $0x20] sm:$0xff] }
   0x5   :  { %581 = vmatpush3.bf16.msra.mxu0 %v578_v3  ;;  %588 = vmatpush3.bf16.msra.mxu1 %v578_v3  ;;  %v69_v14 = vsub.f32 %v17_v11, %v43_v12  ;;  %v44_v16 = vld [vmem:[%s870_s1 + $0x18] sm:$0xff]  ;;  %v45_v18 = vld [vmem:[%s870_s1 + $0x20] sm:$0xff]  ;;  %v20_v19 = vld [vmem:[%s869_s0 + $0x28] sm:$0xff] }
   0x6   :  { %539 = vmatprep.mubr.msk.f32.mxu0 %vm97_vm0, %v67_v8  ;;  %583 = vmatprep.subr.bf16.mxu0 %v582_v7  ;;  %v46_v20 = vld [vmem:[%s870_s1 + $0x28] sm:$0xff]  ;;  %v29_v21 = vld [vmem:[%s869_s0 + $0x70] sm:$0xff]  ;;  %v70_v22 = vsub.f32 %v18_v15, %v44_v16  ;;  %v30_v26 = vld [vmem:[%s869_s0 + $0x78] sm:$0xff]  ;;  %v71_v28 = vsub.f32 %v19_v17, %v45_v18 }
   0x7   :  { %587 = vmatprep.subr.bf16.mxu1 %v582_v7  ;;  %v21_v23 = vld [vmem:[%s869_s0 + $0x30] sm:$0xff]  ;;  %v56_v27 = vld [vmem:[%s870_s1 + $0x78] sm:$0xff]  ;;  %v31_v31 = vld [vmem:[%s869_s0 + $0x80] sm:$0xff]  ;;  %v72_v38 = vsub.f32 %v20_v19, %v46_v20 }
   0x8   :  { %v47_v24 = vld [vmem:[%s870_s1 + $0x30] sm:$0xff]  ;;  %v82_v30 = vsub.f32 %v30_v26, %v56_v27  ;;  %v57_v32 = vld [vmem:[%s870_s1 + $0x80] sm:$0xff]  ;;  %v32_v33 = vld [vmem:[%s869_s0 + $0x88] sm:$0xff] }
   0x9   :  { %585 = vmatpush3.bf16.msra.mxu0 %v582_v7  ;;  %589 = vmatpush3.bf16.msra.mxu1 %v582_v7  ;;  %v55_v25 = vld [vmem:[%s870_s1 + $0x70] sm:$0xff]  ;;  %v83_v34 = vsub.f32 %v31_v31, %v57_v32  ;;  %v58_v35 = vld [vmem:[%s870_s1 + $0x88] sm:$0xff]  ;;  %v22_v39 = vld [vmem:[%s869_s0 + $0x38] sm:$0xff]  ;;  %v73_v42 = vsub.f32 %v21_v23, %v47_v24 }
   0xa   :  { %v81_v29 = vsub.f32 %v29_v21, %v55_v25  ;;  %v33_v36 = vld [vmem:[%s869_s0 + $0x90] sm:$0xff]  ;;  %v48_v40 = vld [vmem:[%s870_s1 + $0x38] sm:$0xff]  ;;  %v84_v41 = vsub.f32 %v32_v33, %v58_v35  ;;  %v23_v43 = vld [vmem:[%s869_s0 + $0x40] sm:$0xff] }
   0xb   :  { %v59_v37 = vld [vmem:[%s870_s1 + $0x90] sm:$0xff]  ;;  %v34_v45 = vld [vmem:[%s869_s0 + $0x98] sm:$0xff]  ;;  %v49_v47 = vld [vmem:[%s870_s1 + $0x40] sm:$0xff] }
   0xc   :  { %540 = vmatmul.mubr.msk.f32.vlgmr.msra.gmra.mrb[0].mxu0 %vm97_vm0, %v68_v13  ;;  %560 = vmatprep.mubr.msk.f32.mxu1 %vm97_vm0, %v81_v29  ;;  %v85_v44 = vsub.f32 %v33_v36, %v59_v37  ;;  %v60_v46 = vld [vmem:[%s870_s1 + $0x98] sm:$0xff]  ;;  %v35_v48 = vld [vmem:[%s869_s0 + $0xa0] sm:$0xff] }
   0xd   :  { %542 = vmatprep.mubr.msk.f32.mxu0 %vm97_vm0, %v69_v14  ;;  %561 = vmatmul.mubr.msk.f32.vlgmr.msra.gmra.mrb[0].mxu1 %vm97_vm0, %v82_v30  ;;  %v61_v49 = vld [vmem:[%s870_s1 + $0xa0] sm:$0xff] }
   0xe   :  { %563 = vmatprep.mubr.msk.f32.mxu1 %vm97_vm0, %v83_v34 }
  0x10   :  { %543 = vmatmul.mubr.msk.f32.gmra.mrb[2].mxu0 %vm97_vm0, %v70_v22 }
  0x11   :  { %545 = vmatprep.mubr.msk.f32.mxu0 %vm97_vm0, %v71_v28 }
  0x12   :  { %8 = vsyncpa [#allocation3], 0  ;;  %v74_v50 = vsub.f32 %v22_v39, %v48_v40  ;;  %v24_v51 = vld [vmem:[%s869_s0 + $0x48] sm:$0xff]  ;;  %564 = vmatmul.mubr.msk.f32.gmra.mrb[2].mxu1 %vm97_vm0, %v84_v41  ;;  %v86_v53 = vsub.f32 %v34_v45, %v60_v46  ;;  %v75_v54 = vsub.f32 %v23_v43, %v49_v47  ;;  %v25_v55 = vld [vmem:[%s869_s0 + $0x50] sm:$0xff]  ;;  %v87_v56 = vsub.f32 %v35_v48, %v61_v49 }
  0x13   :  { %v50_v52 = vld [vmem:[%s870_s1 + $0x48] sm:$0xff]  ;;  %566 = vmatprep.mubr.msk.f32.mxu1 %vm97_vm0, %v85_v44  ;;  %v51_v59 = vld [vmem:[%s870_s1 + $0x50] sm:$0xff]  ;;  %v26_v63 = vld [vmem:[%s869_s0 + $0x58] sm:$0xff]  ;;  %vm397_vm1 = vcmask 195584   ;;  %vm447_vm2 = vcmask 190464  }
  0x14   :  { %546 = vmatmul.mubr.msk.f32.gmra.mrb[4].mxu0 %vm97_vm0, %v72_v38  ;;  %v36_v57 = vld [vmem:[%s869_s0 + $0xa8] sm:$0xff]  ;;  %v37_v60 = vld [vmem:[%s869_s0 + $0xb0] sm:$0xff]  ;;  %v76_v62 = vsub.f32 %v24_v51, %v50_v52  ;;  %v52_v0 = vld [vmem:[%s870_s1 + $0x58] sm:$0xff]  ;;  %v77_v2 = vsub.f32 %v25_v55, %v51_v59 }
  0x15   :  { %548 = vmatprep.mubr.msk.f32.mxu0 %vm97_vm0, %v73_v42  ;;  %v62_v58 = vld [vmem:[%s870_s1 + $0xa8] sm:$0xff]  ;;  %v63_v61 = vld [vmem:[%s870_s1 + $0xb0] sm:$0xff]  ;;  %v27_v3 = vld [vmem:[%s869_s0 + $0x60] sm:$0xff]  ;;  %v78_v10 = vsub.f32 %v26_v63, %v52_v0 }
  0x16   :  { %567 = vmatmul.mubr.msk.f32.gmra.mrb[4].mxu1 %vm97_vm0, %v86_v53  ;;  %v88_v1 = vsub.f32 %v36_v57, %v62_v58  ;;  %v89_v4 = vsub.f32 %v37_v60, %v63_v61  ;;  %v38_v5 = vld [vmem:[%s869_s0 + $0xb8] sm:$0xff]  ;;  %v53_v7 = vld [vmem:[%s870_s1 + $0x60] sm:$0xff]  ;;  %v28_v11 = vld [vmem:[%s869_s0 + $0x68] sm:$0xff] }
  0x17   :  { %569 = vmatprep.mubr.msk.f32.mxu1 %vm97_vm0, %v87_v56  ;;  %v64_v6 = vld [vmem:[%s870_s1 + $0xb8] sm:$0xff]  ;;  %v39_v8 = vld [vmem:[%s869_s0 + $0xc0] sm:$0xff]  ;;  %v79_v13 = vsub.f32 %v27_v3, %v53_v7  ;;  %v54_v14 = vld [vmem:[%s870_s1 + $0x68] sm:$0xff] }
  0x18   :  { %549 = vmatmul.mubr.msk.f32.gmra.mrb[6].mxu0 %vm97_vm0, %v74_v50  ;;  %v65_v9 = vld [vmem:[%s870_s1 + $0xc0] sm:$0xff]  ;;  %v90_v12 = vsub.f32 %v38_v5, %v64_v6  ;;  %v40_v16 = vld [vmem:[%s869_s0 + $0xc8] sm:$0x7]  ;;  %v80_v18 = vsub.f32 %v28_v11, %v54_v14  ;;  %s617_s0 = smov [#allocation2]  }
  0x19   :  { %551 = vmatprep.mubr.msk.f32.mxu0 %vm97_vm0, %v75_v54  ;;  %v91_v15 = vsub.f32 %v39_v8, %v65_v9  ;;  %v66_v17 = vld [vmem:[%s870_s1 + $0xc8] sm:$0x7]  ;;  %s467_s1 = sshll.u32 %s617_s0, 4  ;;  %s468_s1 = int_to_ptr.vmem [resolvable:$true] %s467_s1 }
  0x1a   :  { %570 = vmatmul.mubr.msk.f32.gmra.mrb[6].mxu1 %vm97_vm0, %v88_v1  ;;  %v92_v19 = vsub.f32 %v40_v16, %v66_v17  ;;  %s593_s13 = scalar_lea.vmem %s468_s1, 128  ;;  %p598_p1 = scmp.lt.s32.totalorder %s468_s1, %s468_s1 }
  0x1b   :  { %572 = vmatprep.mubr.msk.f32.mxu1 %vm97_vm0, %v89_v4  ;;  %p594_p0 = scmp.ne.s32.totalorder %s468_s1, %s593_s13  ;;  %p599_p2 = scmp.lt.s32.totalorder %s593_s13, %s593_s13 }
  0x1c   :  { %552 = vmatmul.mubr.msk.f32.gmra.mrb[8].mxu0 %vm97_vm0, %v76_v62 }
  0x1d   :  { %554 = vmatprep.mubr.msk.f32.mxu0 %vm97_vm0, %v77_v2  ;;  %p600_p3 = por %p599_p2, %p598_p1 }
  0x1e   :  { %573 = vmatmul.mubr.msk.f32.gmra.mrb[8].mxu1 %vm97_vm0, %v90_v12 }
  0x1f   :  { %575 = vmatprep.mubr.msk.f32.mxu1 %vm97_vm0, %v91_v15  ;;  %p601_p4 = pnand %p600_p3, %p594_p0 }
  0x20   :  { %555 = vmatmul.mubr.msk.f32.gmra.mrb[10].mxu0 %vm97_vm0, %v78_v10 }
  0x21   :  { %557 = vmatprep.mubr.msk.f32.mxu0 %vm97_vm0, %v79_v13 }
  0x22   :  { %576 = vmatmul.mubr.msk.f32.gmra.mrb[10].mxu1 %vm97_vm0, %v92_v19 }
  0x24   :  { %558 = vmatmul.mubr.msk.f32.gmra.mrb[12].mxu0 %vm97_vm0, %v80_v18 }
  0xdf   :  { %v541_v20 = vpop.f32.mrb[0].mxu0 }
  0xe0   :  { %v372_v21 = vmul.f32 %v541_v20, %v541_v20  ;;  %v242_v22 = vpop.f32.mrb[1].mxu0  ;;  %v562_v27 = vpop.f32.mrb[0].mxu1 }
  0xe1   :  { %v371_v23 = vmul.f32 %v242_v22, %v242_v22  ;;  %v312_v30 = vpop.f32.mrb[1].mxu1 }
  0xe2   :  { %v399_v24 = vsel %vm397_vm1, %v372_v21, 0.0  ;;  %v385_v18 = vmul.f32 %v312_v30, %v312_v30 }
  0xe3   :  { %v398_v25 = vsel %vm397_vm1, %v371_v23, 0.0  ;;  %v544_v26 = vpop.f32.mrb[2].mxu0  ;;  %v386_v23 = vmul.f32 %v562_v27, %v562_v27 }
  0xe4   :  { %v400_v28 = vadd.f32 %v399_v24, %v398_v25  ;;  %v252_v29 = vpop.f32.mrb[3].mxu0  ;;  %v374_v31 = vmul.f32 %v544_v26, %v544_v26  ;;  %v425_v24 = vsel %vm397_vm1, %v385_v18, 0.0 }
  0xe5   :  { %v373_v32 = vmul.f32 %v252_v29, %v252_v29  ;;  %v565_v35 = vpop.f32.mrb[2].mxu1  ;;  %v427_v29 = vsel %vm397_vm1, %v386_v23, 0.0 }
  0xe6   :  { %v322_v38 = vpop.f32.mrb[3].mxu1  ;;  %v403_v39 = vsel %vm397_vm1, %v374_v31, 0.0  ;;  %v388_v31 = vmul.f32 %v565_v35, %v565_v35 }
  0xe7   :  { %v401_v33 = vsel %vm397_vm1, %v373_v32, 0.0  ;;  %v547_v34 = vpop.f32.mrb[4].mxu0  ;;  %v387_v25 = vmul.f32 %v322_v38, %v322_v38 }
  0xe8   :  { %v402_v36 = vadd.f32 %v401_v33, %v400_v28  ;;  %v262_v37 = vpop.f32.mrb[5].mxu0  ;;  %v376_v40 = vmul.f32 %v547_v34, %v547_v34 }
  0xe9   :  { %v375_v41 = vmul.f32 %v262_v37, %v262_v37  ;;  %v568_v45 = vpop.f32.mrb[4].mxu1  ;;  %v429_v32 = vsel %vm397_vm1, %v387_v25, 0.0 }
  0xea   :  { %v404_v42 = vadd.f32 %v403_v39, %v402_v36  ;;  %v332_v48 = vpop.f32.mrb[5].mxu1  ;;  %v407_v49 = vsel %vm397_vm1, %v376_v40, 0.0  ;;  %v431_v36 = vsel %vm397_vm1, %v388_v31, 0.0  ;;  %v390_v37 = vmul.f32 %v568_v45, %v568_v45 }
  0xeb   :  { %v405_v43 = vsel %vm397_vm1, %v375_v41, 0.0  ;;  %v550_v44 = vpop.f32.mrb[6].mxu0  ;;  %v389_v33 = vmul.f32 %v332_v48, %v332_v48 }
  0xec   :  { %v406_v46 = vadd.f32 %v405_v43, %v404_v42  ;;  %v272_v47 = vpop.f32.mrb[7].mxu0  ;;  %v378_v50 = vmul.f32 %v550_v44, %v550_v44  ;;  %v435_v38 = vsel %vm397_vm1, %v390_v37, 0.0 }
  0xed   :  { %v377_v51 = vmul.f32 %v272_v47, %v272_v47  ;;  %v571_v55 = vpop.f32.mrb[6].mxu1  ;;  %v433_v39 = vsel %vm397_vm1, %v389_v33, 0.0 }
  0xee   :  { %v408_v52 = vadd.f32 %v407_v49, %v406_v46  ;;  %v342_v58 = vpop.f32.mrb[7].mxu1  ;;  %v411_v59 = vsel %vm397_vm1, %v378_v50, 0.0  ;;  %v392_v42 = vmul.f32 %v571_v55, %v571_v55 }
  0xef   :  { %v409_v53 = vsel %vm397_vm1, %v377_v51, 0.0  ;;  %v553_v54 = vpop.f32.mrb[8].mxu0  ;;  %v391_v40 = vmul.f32 %v342_v58, %v342_v58 }
  0xf0   :  { %v410_v56 = vadd.f32 %v409_v53, %v408_v52  ;;  %v282_v57 = vpop.f32.mrb[9].mxu0  ;;  %v380_v60 = vmul.f32 %v553_v54, %v553_v54  ;;  %v439_v47 = vsel %vm397_vm1, %v392_v42, 0.0 }
  0xf1   :  { %v379_v61 = vmul.f32 %v282_v57, %v282_v57  ;;  %v574_v1 = vpop.f32.mrb[8].mxu1  ;;  %v437_v43 = vsel %vm397_vm1, %v391_v40, 0.0 }
  0xf2   :  { %v412_v62 = vadd.f32 %v411_v59, %v410_v56  ;;  %v352_v4 = vpop.f32.mrb[9].mxu1  ;;  %v415_v5 = vsel %vm397_vm1, %v380_v60, 0.0  ;;  %v394_v48 = vmul.f32 %v574_v1, %v574_v1 }
  0xf3   :  { %v413_v63 = vsel %vm397_vm1, %v379_v61, 0.0  ;;  %v556_v0 = vpop.f32.mrb[10].mxu0  ;;  %v393_v44 = vmul.f32 %v352_v4, %v352_v4 }
  0xf4   :  { %v414_v2 = vadd.f32 %v413_v63, %v412_v62  ;;  %v292_v3 = vpop.f32.mrb[11].mxu0  ;;  %v382_v6 = vmul.f32 %v556_v0, %v556_v0  ;;  %v443_v52 = vsel %vm397_vm1, %v394_v48, 0.0 }
  0xf5   :  { %v381_v7 = vmul.f32 %v292_v3, %v292_v3  ;;  %v577_v11 = vpop.f32.mrb[10].mxu1  ;;  %v441_v49 = vsel %vm397_vm1, %v393_v44, 0.0 }
  0xf6   :  { %v416_v8 = vadd.f32 %v415_v5, %v414_v2  ;;  %v362_v14 = vpop.f32.mrb[11].mxu1  ;;  %v419_v15 = vsel %vm397_vm1, %v382_v6, 0.0  ;;  %v396_v53 = vmul.f32 %v577_v11, %v577_v11 }
  0xf7   :  { %v417_v9 = vsel %vm397_vm1, %v381_v7, 0.0  ;;  %v559_v10 = vpop.f32.mrb[12].mxu0  ;;  %v395_v50 = vmul.f32 %v362_v14, %v362_v14 }
  0xf8   :  { %v418_v12 = vadd.f32 %v417_v9, %v416_v8  ;;  %v302_v13 = vpop.f32.mrb[13].mxu0  ;;  %v384_v16 = vmul.f32 %v559_v10, %v559_v10  ;;  %v448_v57 = vsel %vm447_vm2, %v396_v53, 0.0 }
  0xf9   :  { %v383_v17 = vmul.f32 %v302_v13, %v302_v13  ;;  %v445_v54 = vsel %vm397_vm1, %v395_v50, 0.0 }
  0xfa   :  { %v420_v19 = vadd.f32 %v419_v15, %v418_v12  ;;  %v423_v22 = vsel %vm397_vm1, %v384_v16, 0.0 }
  0xfb   :  { %v421_v20 = vsel %vm397_vm1, %v383_v17, 0.0 }
  0xfc   :  { %v422_v21 = vadd.f32 %v421_v20, %v420_v19 }
  0xfe   :  { %v424_v26 = vadd.f32 %v423_v22, %v422_v21 }
 0x100   :  { %v426_v28 = vadd.f32 %v425_v24, %v424_v26 }
 0x102   :  { %v428_v34 = vadd.f32 %v427_v29, %v426_v28 }
 0x104   :  { %v430_v30 = vadd.f32 %v429_v32, %v428_v34 }
 0x106   :  { %v432_v27 = vadd.f32 %v431_v36, %v430_v30 }
 0x108   :  { %v434_v41 = vadd.f32 %v433_v39, %v432_v27 }
 0x10a   :  { %v436_v35 = vadd.f32 %v435_v38, %v434_v41 }
 0x10c   :  { %v438_v46 = vadd.f32 %v437_v43, %v436_v35 }
 0x10e   :  { %v440_v45 = vadd.f32 %v439_v47, %v438_v46 }
 0x110   :  { %v442_v51 = vadd.f32 %v441_v49, %v440_v45 }
 0x112   :  { %v444_v56 = vadd.f32 %v443_v52, %v442_v51 }
 0x114   :  { %v446_v55 = vadd.f32 %v445_v54, %v444_v56 }
 0x116   :  { %v449_v58 = vadd.f32 %v448_v57, %v446_v55 }
 0x118   :  { %450 = vadd.xlane.f32.xlu0 %v449_v58 }
 0x1a5   :  { %v451_v59 = vpop.xlane.xlu0 %450 }
 0x1a6   :  { %v452_v60 = vrot.slane %v451_v59, 4 }
 0x1a8   :  { %v453_v61 = vadd.f32 %v452_v60, %v451_v59 }
 0x1aa   :  { %v454_v62 = vrot.slane %v453_v61, 2 }
 0x1ac   :  { %v455_v63 = vadd.f32 %v454_v62, %v453_v61 }
 0x1ae   :  { %v456_v0 = vrot.slane %v455_v63, 1 }
 0x1b0   :  { %v457_v1 = vadd.f32 %v456_v0, %v455_v63 }
 0x1b2   :  { %590 = vpush %v457_v1 }
 0x1e3   :  { %s591_s12 = spop %590 }
 0x1e4   :  { %v459_v2 = vstv %s591_s12 }
 0x1e5   :  { %460 = vst [vmem:[#allocation2] sm:$0xff] %v459_v2 }
 0x1e6   :  { %604 = shalt.err (!%p601_p4)
}
 0x1e7   :  { %s605_s16 = scalar_lea.hbm %s872_s3, 128 }
 0x1e8   :  { %p606_p5 = scmp.ne.s32.totalorder %s872_s3, %s605_s16  ;;  %p609_p6 = scmp.lt.u32.totalorder %s605_s16, %s872_s3 }
 0x1ea   :  { %p611_p7 = pnand %p609_p6, %p606_p5 }
 0x1ec   :  { %614 = shalt.err (!%p611_p7)
}
 0x1ed   :  { %470 = dma.vmem_to_hbm [thread:$0]  %s468_s1, 128, %s872_s3, [#allocation3]  }
 0x1ee   :  { %615 = dma.done.wait [#allocation3], 128  }
 0x1ef   :  { %616 = vsyncadd [#allocation3], 4294967168 }
 0x1f0   :  { %474 = vsyncpa [#allocation3], 1 }

</bundles_post_ra>
